<compile_context>
chip_gen: v5e
topology: v5e:2x2
jax: 0.10.0
libtpu: 0.0.40
codegen_flags: <defaults>
</compile_context>

<pallas_src>
import functools

import jax
import jax.numpy as jnp
from jax.experimental import pallas as pl
from jax.experimental.pallas import tpu as pltpu


def _round_up(n, m):
    return ((n + m - 1) // m) * m


def _cdiv(a, b):
    return (a + b - 1) // b


def _ae_kernel(x_ref,
               w1_ref, b1_ref,
               w2_ref, b2_ref,
               w3_ref, b3_ref,
               w4_ref, b4_ref,
               o_ref,
               *, relu_dtype):
    # x arrives in its stored dtype; cast to bf16 in-kernel (no wrapper-side
    # HBM round trip).
    x = x_ref[...].astype(jnp.bfloat16)

    def linear(h_bf16, w_ref, b_ref):
        # bf16 x bf16 MXU matmul with f32 accumulation, f32 bias add.
        return jnp.dot(h_bf16, w_ref[...],
                       preferred_element_type=jnp.float32) + b_ref[...]

    def relu_to_bf16(h_f32):
        # cast is monotone and preserves 0 => cast-then-max == max-then-cast.
        # relu_dtype: bf16 on v6e/v7x (bf16 VPU), f32 on v5e (no bf16 VPU).
        return jnp.maximum(h_f32.astype(relu_dtype), 0.0).astype(jnp.bfloat16)

    h = relu_to_bf16(linear(x, w1_ref, b1_ref))    # encoder_PIPE1
    h = relu_to_bf16(linear(h, w2_ref, b2_ref))    # encoder_PIPE2 (hidden padded to 128)
    h = relu_to_bf16(linear(h, w3_ref, b3_ref))    # decoder_PIPE1
    y = linear(h, w4_ref, b4_ref)                  # decoder_PIPE2 pre-activation (f32)

    # sigmoid(y) = 0.5 * (1 + tanh(y / 2)) : one EUP transcendental / element.
    o_ref[...] = (0.5 * jnp.tanh(0.5 * y) + 0.5).astype(o_ref.dtype)


def autoencoder_pipe_forward(x, params, *, tm=1024, out_dtype=None, relu_dtype=None):
    """Fused Autoencoder_PIPE forward.

    x:      (B, input_dim) float array (streamed as-is, cast to bf16 in-kernel).
    params: dict with w1..w4 stored TRANSPOSED as (in_features, out_features)
            and biases b1..b4 of shape (out_features,) or (1, out_features).
    """
    B, input_dim = x.shape
    if out_dtype is None:
        out_dtype = x.dtype  # use jnp.bfloat16 to halve output HBM writeback
    if relu_dtype is None:
        kind = jax.devices()[0].device_kind.lower()
        relu_dtype = jnp.float32 if "v5" in kind else jnp.bfloat16

    # --- weight prep (tiny arrays; negligible cost, const-folded under jit) ---
    def wt(name):
        return params[name].astype(jnp.bfloat16)

    def bias(name):
        return params[name].reshape(1, -1).astype(jnp.float32)

    w1, b1 = wt("w1"), bias("b1")
    w2, b2 = wt("w2"), bias("b2")
    w3, b3 = wt("w3"), bias("b3")
    w4, b4 = wt("w4"), bias("b4")

    # Lane-densify the bottleneck: zero-pad hidden_dim up to a multiple of 128.
    hidden = w2.shape[1]
    hidden_p = _round_up(hidden, 128)
    if hidden_p != hidden:
        pad = hidden_p - hidden
        w2 = jnp.pad(w2, ((0, 0), (0, pad)))
        b2 = jnp.pad(b2, ((0, 0), (0, pad)))
        w3 = jnp.pad(w3, ((0, pad), (0, 0)))

    # --- balanced batch tiling; last partial block is masked by Pallas, so no
    # wrapper-side jnp.pad and waste is < 8 rows per tile. ---
    grid_n = _cdiv(B, tm)
    if B >= 1024:
        grid_n = max(grid_n, 4)   # >= 2 steps per TensorCore on v7x megacore
        grid_n += grid_n % 2      # even split across the two cores
    tm_eff = _round_up(_cdiv(B, grid_n), 8)
    grid_n = _cdiv(B, tm_eff)

    def resident(arr):
        # Whole (small) array resident in VMEM; constant block index -> one DMA.
        return pl.BlockSpec(arr.shape, lambda i: (0, 0))

    kernel = functools.partial(_ae_kernel, relu_dtype=relu_dtype)

    return pl.pallas_call(
        kernel,
        out_shape=jax.ShapeDtypeStruct((B, input_dim), out_dtype),
        grid_spec=pltpu.PrefetchScalarGridSpec(
            num_scalar_prefetch=0,
            grid=(grid_n,),
            in_specs=[
                pl.BlockSpec((tm_eff, input_dim), lambda i: (i, 0)),
                resident(w1), resident(b1),
                resident(w2), resident(b2),
                resident(w3), resident(b3),
                resident(w4), resident(b4),
            ],
            out_specs=pl.BlockSpec((tm_eff, input_dim), lambda i: (i, 0)),
        ),
        compiler_params=pltpu.CompilerParams(
            dimension_semantics=("parallel",)),
    )(x, w1, b1, w2, b2, w3, b3, w4, b4)


def init_params(key, input_dim, hidden_dim):
    """Deterministic init mimicking nn.Linear default (uniform +/- 1/sqrt(fan_in)).

    Weights are stored TRANSPOSED (in, out) for the kernel's x @ W + b."""
    dims = [(input_dim, 128), (128, hidden_dim), (hidden_dim, 128), (128, input_dim)]
    params = {}
    for idx, (fan_in, fan_out) in enumerate(dims, start=1):
        key, kw, kb = jax.random.split(key, 3)
        bound = 1.0 / jnp.sqrt(jnp.float32(fan_in))
        params[f"w{idx}"] = jax.random.uniform(
            kw, (fan_in, fan_out), jnp.float32, -bound, bound)
        params[f"b{idx}"] = jax.random.uniform(
            kb, (fan_out,), jnp.float32, -bound, bound)
    return params


def reference_forward(x, params):
    """Pure-JAX reference, quantizing x / weights / intermediates to bf16 the
    same way the kernel does, so the tolerance only absorbs accumulation-order
    and hardware-tanh differences (intentional precision tradeoff vs the pure
    f32 PyTorch module)."""
    def q(a):
        return a.astype(jnp.bfloat16).astype(jnp.float32)

    def b(name):
        return params[name].reshape(1, -1).astype(jnp.float32)

    h = jnp.maximum(q(x) @ q(params["w1"]) + b("b1"), 0.0)
    h = jnp.maximum(q(h) @ q(params["w2"]) + b("b2"), 0.0)
    h = jnp.maximum(q(h) @ q(params["w3"]) + b("b3"), 0.0)
    return jax.nn.sigmoid(q(h) @ q(params["w4"]) + b("b4"))


if __name__ == "__main__":
    input_dim = 256
    hidden_dim = 32
    batch = 100          # NOT a multiple of 8 -> exercises the masked partial tile

    key = jax.random.PRNGKey(0)
    kx, kp = jax.random.split(key)
    x = jax.random.uniform(kx, (batch, input_dim), jnp.float32)  # inputs in [0,1)
    params = init_params(kp, input_dim, hidden_dim)

    fwd = jax.jit(autoencoder_pipe_forward)
    out = jax.block_until_ready(fwd(x, params))

    ref = reference_forward(x, params)
    assert out.shape == (batch, input_dim)
    assert out.dtype == x.dtype
    max_err = float(jnp.max(jnp.abs(out.astype(jnp.float32) - ref)))
    assert max_err < 2e-2, f"mismatch vs JAX reference, max abs err = {max_err}"

    print("KERNEL_OK")
</pallas_src>

<mosaic_0001>
module attributes {stable_mosaic.version = 11 : i64} {
  func.func @_ae_kernel(%arg0: i32, %arg1: memref<104x256xf32, #tpu.memory_space<vmem>>, %arg2: memref<256x128xbf16, #tpu.memory_space<vmem>>, %arg3: memref<1x128xf32, #tpu.memory_space<vmem>>, %arg4: memref<128x128xbf16, #tpu.memory_space<vmem>>, %arg5: memref<1x128xf32, #tpu.memory_space<vmem>>, %arg6: memref<128x128xbf16, #tpu.memory_space<vmem>>, %arg7: memref<1x128xf32, #tpu.memory_space<vmem>>, %arg8: memref<128x256xbf16, #tpu.memory_space<vmem>>, %arg9: memref<1x256xf32, #tpu.memory_space<vmem>>, %arg10: memref<104x256xf32, #tpu.memory_space<vmem>>) attributes {dimension_semantics = [#tpu.dimension_semantics<parallel>], iteration_bounds = array<i64: 1>, scalar_prefetch = 0 : i64, scratch_operands = 0 : i64, tpu.core_type = #tpu.core_type<tc>, window_params = [{transform_indices = @transform_0, window_bounds = array<i64: 104, 256>}, {pipeline_mode = #tpu.pipeline_mode<synchronous>, transform_indices = @transform_1, window_bounds = array<i64: 256, 128>}, {pipeline_mode = #tpu.pipeline_mode<synchronous>, transform_indices = @transform_2, window_bounds = array<i64: 1, 128>}, {pipeline_mode = #tpu.pipeline_mode<synchronous>, transform_indices = @transform_3, window_bounds = array<i64: 128, 128>}, {pipeline_mode = #tpu.pipeline_mode<synchronous>, transform_indices = @transform_4, window_bounds = array<i64: 1, 128>}, {pipeline_mode = #tpu.pipeline_mode<synchronous>, transform_indices = @transform_5, window_bounds = array<i64: 128, 128>}, {pipeline_mode = #tpu.pipeline_mode<synchronous>, transform_indices = @transform_6, window_bounds = array<i64: 1, 128>}, {pipeline_mode = #tpu.pipeline_mode<synchronous>, transform_indices = @transform_7, window_bounds = array<i64: 128, 256>}, {pipeline_mode = #tpu.pipeline_mode<synchronous>, transform_indices = @transform_8, window_bounds = array<i64: 1, 256>}, {transform_indices = @transform_9, window_bounds = array<i64: 104, 256>}]} {
    %c0 = arith.constant 0 : index
    %c0_0 = arith.constant 0 : index
    %0 = vector.load %arg1[%c0, %c0_0] : memref<104x256xf32, #tpu.memory_space<vmem>>, vector<104x256xf32>
    %1 = arith.truncf %0 : vector<104x256xf32> to vector<104x256xbf16>
    %c0_1 = arith.constant 0 : index
    %c0_2 = arith.constant 0 : index
    %2 = vector.load %arg2[%c0_1, %c0_2] : memref<256x128xbf16, #tpu.memory_space<vmem>>, vector<256x128xbf16>
    %cst = arith.constant dense<0.000000e+00> : vector<104x128xf32>
    %3 = tpu.matmul %1, %2, %cst {dimension_numbers = #tpu.dot_dimension_numbers<[1], [0], [0], [1], [0, 0, 1, 1], [], []>} : vector<104x256xbf16>, vector<256x128xbf16>, vector<104x128xf32> -> vector<104x128xf32>
    %c0_3 = arith.constant 0 : index
    %c0_4 = arith.constant 0 : index
    %4 = vector.load %arg3[%c0_3, %c0_4] : memref<1x128xf32, #tpu.memory_space<vmem>>, vector<1x128xf32>
    %5 = vector.broadcast %4 : vector<1x128xf32> to vector<104x128xf32>
    %6 = arith.addf %3, %5 : vector<104x128xf32>
    %7 = arith.truncf %6 : vector<104x128xf32> to vector<104x128xbf16>
    %cst_5 = arith.constant 0.000000e+00 : bf16
    %8 = vector.broadcast %cst_5 : bf16 to vector<104x128xbf16>
    %9 = arith.maximumf %7, %8 : vector<104x128xbf16>
    %c0_6 = arith.constant 0 : index
    %c0_7 = arith.constant 0 : index
    %10 = vector.load %arg4[%c0_6, %c0_7] : memref<128x128xbf16, #tpu.memory_space<vmem>>, vector<128x128xbf16>
    %cst_8 = arith.constant dense<0.000000e+00> : vector<104x128xf32>
    %11 = tpu.matmul %9, %10, %cst_8 {dimension_numbers = #tpu.dot_dimension_numbers<[1], [0], [0], [1], [0, 0, 1, 1], [], []>} : vector<104x128xbf16>, vector<128x128xbf16>, vector<104x128xf32> -> vector<104x128xf32>
    %c0_9 = arith.constant 0 : index
    %c0_10 = arith.constant 0 : index
    %12 = vector.load %arg5[%c0_9, %c0_10] : memref<1x128xf32, #tpu.memory_space<vmem>>, vector<1x128xf32>
    %13 = vector.broadcast %12 : vector<1x128xf32> to vector<104x128xf32>
    %14 = arith.addf %11, %13 : vector<104x128xf32>
    %15 = arith.truncf %14 : vector<104x128xf32> to vector<104x128xbf16>
    %cst_11 = arith.constant 0.000000e+00 : bf16
    %16 = vector.broadcast %cst_11 : bf16 to vector<104x128xbf16>
    %17 = arith.maximumf %15, %16 : vector<104x128xbf16>
    %c0_12 = arith.constant 0 : index
    %c0_13 = arith.constant 0 : index
    %18 = vector.load %arg6[%c0_12, %c0_13] : memref<128x128xbf16, #tpu.memory_space<vmem>>, vector<128x128xbf16>
    %cst_14 = arith.constant dense<0.000000e+00> : vector<104x128xf32>
    %19 = tpu.matmul %17, %18, %cst_14 {dimension_numbers = #tpu.dot_dimension_numbers<[1], [0], [0], [1], [0, 0, 1, 1], [], []>} : vector<104x128xbf16>, vector<128x128xbf16>, vector<104x128xf32> -> vector<104x128xf32>
    %c0_15 = arith.constant 0 : index
    %c0_16 = arith.constant 0 : index
    %20 = vector.load %arg7[%c0_15, %c0_16] : memref<1x128xf32, #tpu.memory_space<vmem>>, vector<1x128xf32>
    %21 = vector.broadcast %20 : vector<1x128xf32> to vector<104x128xf32>
    %22 = arith.addf %19, %21 : vector<104x128xf32>
    %23 = arith.truncf %22 : vector<104x128xf32> to vector<104x128xbf16>
    %cst_17 = arith.constant 0.000000e+00 : bf16
    %24 = vector.broadcast %cst_17 : bf16 to vector<104x128xbf16>
    %25 = arith.maximumf %23, %24 : vector<104x128xbf16>
    %c0_18 = arith.constant 0 : index
    %c0_19 = arith.constant 0 : index
    %26 = vector.load %arg8[%c0_18, %c0_19] : memref<128x256xbf16, #tpu.memory_space<vmem>>, vector<128x256xbf16>
    %cst_20 = arith.constant dense<0.000000e+00> : vector<104x256xf32>
    %27 = tpu.matmul %25, %26, %cst_20 {dimension_numbers = #tpu.dot_dimension_numbers<[1], [0], [0], [1], [0, 0, 1, 1], [], []>} : vector<104x128xbf16>, vector<128x256xbf16>, vector<104x256xf32> -> vector<104x256xf32>
    %c0_21 = arith.constant 0 : index
    %c0_22 = arith.constant 0 : index
    %28 = vector.load %arg9[%c0_21, %c0_22] : memref<1x256xf32, #tpu.memory_space<vmem>>, vector<1x256xf32>
    %29 = vector.broadcast %28 : vector<1x256xf32> to vector<104x256xf32>
    %30 = arith.addf %27, %29 : vector<104x256xf32>
    %cst_23 = arith.constant 5.000000e-01 : f32
    %31 = vector.broadcast %cst_23 : f32 to vector<104x256xf32>
    %32 = arith.mulf %31, %30 : vector<104x256xf32>
    %33 = math.tanh %32 : vector<104x256xf32>
    %cst_24 = arith.constant 5.000000e-01 : f32
    %34 = vector.broadcast %cst_24 : f32 to vector<104x256xf32>
    %35 = arith.mulf %34, %33 : vector<104x256xf32>
    %cst_25 = arith.constant 5.000000e-01 : f32
    %36 = vector.broadcast %cst_25 : f32 to vector<104x256xf32>
    %37 = arith.addf %35, %36 : vector<104x256xf32>
    %c0_26 = arith.constant 0 : index
    %c0_27 = arith.constant 0 : index
    %38 = vector.load %arg10[%c0_26, %c0_27] : memref<104x256xf32, #tpu.memory_space<vmem>>, vector<104x256xf32>
    tpu.vector_store %arg10[%c0_26, %c0_27], %37 {strides = array<i32>} : memref<104x256xf32, #tpu.memory_space<vmem>>, vector<104x256xf32>,
    return
  }
  func.func @transform_0(%arg0: i32) -> (i32, i32) {
    %c0_i32 = arith.constant 0 : i32
    %c0_i32_0 = arith.constant 0 : i32
    return %arg0, %c0_i32 : i32, i32
  }
  func.func @transform_1(%arg0: i32) -> (i32, i32) {
    %c0_i32 = arith.constant 0 : i32
    %c0_i32_0 = arith.constant 0 : i32
    %c0_i32_1 = arith.constant 0 : i32
    return %c0_i32, %c0_i32_0 : i32, i32
  }
  func.func @transform_2(%arg0: i32) -> (i32, i32) {
    %c0_i32 = arith.constant 0 : i32
    %c0_i32_0 = arith.constant 0 : i32
    %c0_i32_1 = arith.constant 0 : i32
    return %c0_i32, %c0_i32_0 : i32, i32
  }
  func.func @transform_3(%arg0: i32) -> (i32, i32) {
    %c0_i32 = arith.constant 0 : i32
    %c0_i32_0 = arith.constant 0 : i32
    %c0_i32_1 = arith.constant 0 : i32
    return %c0_i32, %c0_i32_0 : i32, i32
  }
  func.func @transform_4(%arg0: i32) -> (i32, i32) {
    %c0_i32 = arith.constant 0 : i32
    %c0_i32_0 = arith.constant 0 : i32
    %c0_i32_1 = arith.constant 0 : i32
    return %c0_i32, %c0_i32_0 : i32, i32
  }
  func.func @transform_5(%arg0: i32) -> (i32, i32) {
    %c0_i32 = arith.constant 0 : i32
    %c0_i32_0 = arith.constant 0 : i32
    %c0_i32_1 = arith.constant 0 : i32
    return %c0_i32, %c0_i32_0 : i32, i32
  }
  func.func @transform_6(%arg0: i32) -> (i32, i32) {
    %c0_i32 = arith.constant 0 : i32
    %c0_i32_0 = arith.constant 0 : i32
    %c0_i32_1 = arith.constant 0 : i32
    return %c0_i32, %c0_i32_0 : i32, i32
  }
  func.func @transform_7(%arg0: i32) -> (i32, i32) {
    %c0_i32 = arith.constant 0 : i32
    %c0_i32_0 = arith.constant 0 : i32
    %c0_i32_1 = arith.constant 0 : i32
    return %c0_i32, %c0_i32_0 : i32, i32
  }
  func.func @transform_8(%arg0: i32) -> (i32, i32) {
    %c0_i32 = arith.constant 0 : i32
    %c0_i32_0 = arith.constant 0 : i32
    %c0_i32_1 = arith.constant 0 : i32
    return %c0_i32, %c0_i32_0 : i32, i32
  }
  func.func @transform_9(%arg0: i32) -> (i32, i32) {
    %c0_i32 = arith.constant 0 : i32
    %c0_i32_0 = arith.constant 0 : i32
    return %arg0, %c0_i32 : i32, i32
  }
}

</mosaic_0001>

<bundles_post_ra>
// kernel: autoencoder_pipe_forward.1
= control target key start
LH: loop header
LB: loop body
LE: loop exit
PB: predicated region body
PF: predicated region fallthrough
CT: control target
= control target key end

     0   :  { %s1725_s0 = inlined_call_operand.vmem [shape: f32[100,256], index: 0, kind: input, shape index: {}]   ;;  %s1726_s1 = inlined_call_operand.vmem [shape: bf16[256,128], index: 1, kind: input, shape index: {}]   ;;  %s1727_s2 = inlined_call_operand.vmem [shape: f32[1,128], index: 2, kind: input, shape index: {}]   ;;  %s1728_s3 = inlined_call_operand.vmem [shape: bf16[128,128], index: 3, kind: input, shape index: {}]   ;;  %s1729_s4 = inlined_call_operand.vmem [shape: f32[1,128], index: 4, kind: input, shape index: {}]   ;;  %s1730_s5 = inlined_call_operand.vmem [shape: bf16[128,128], index: 5, kind: input, shape index: {}]   ;;  %s1731_s6 = inlined_call_operand.vmem [shape: f32[1,128], index: 6, kind: input, shape index: {}]   ;;  %s1732_s7 = inlined_call_operand.vmem [shape: bf16[128,256], index: 7, kind: input, shape index: {}]   ;;  %s1733_s8 = inlined_call_operand.vmem [shape: f32[1,256], index: 8, kind: input, shape index: {}]   ;;  %s1734_s9 = inlined_call_operand.hbm [shape: f32[100,256], index: 9, kind: output, shape index: {}]  }
   0x1   :  { %v1186_v0 = vld [vmem:[%s1726_s1 + $0x38] sm:$0xff]  ;;  %v1185_v2 = vld [vmem:[%s1726_s1 + $0x30] sm:$0xff]  ;;  %v1184_v4 = vld [vmem:[%s1726_s1 + $0x28] sm:$0xff] }
   0x2   :  { %v1194_v1 = vld [vmem:[%s1726_s1 + $0x78] sm:$0xff]  ;;  %205 = vmatpush.bf16.msra.mxu0 %v1186_v0  ;;  %v1193_v3 = vld [vmem:[%s1726_s1 + $0x70] sm:$0xff]  ;;  %1227 = vmatpush.bf16.msra.mxu2 %v1186_v0  ;;  %v1192_v5 = vld [vmem:[%s1726_s1 + $0x68] sm:$0xff] }
   0x3   :  { %248 = vmatpush.bf16.msra.mxu1 %v1194_v1  ;;  %1235 = vmatpush.bf16.msra.mxu3 %v1194_v1 }
   0x6   :  { %206 = vmatpush.bf16.msra.mxu0 %v1185_v2  ;;  %1228 = vmatpush.bf16.msra.mxu2 %v1185_v2 }
   0x7   :  { %249 = vmatpush.bf16.msra.mxu1 %v1193_v3  ;;  %1236 = vmatpush.bf16.msra.mxu3 %v1193_v3 }
   0x8   :  { %14 = vsyncpa [#allocation3], 0  ;;  %v1183_v6 = vld [vmem:[%s1726_s1 + $0x20] sm:$0xff]  ;;  %v1182_v8 = vld [vmem:[%s1726_s1 + $0x18] sm:$0xff]  ;;  %s975_s27 = sshll.u32 %s1734_s9, 4  ;;  %s1329_s28 = smov 16   ;;  %s976_s27 = int_to_ptr.hbm [resolvable:$true] %s975_s27 }
   0x9   :  { %v1191_v7 = vld [vmem:[%s1726_s1 + $0x60] sm:$0xff]  ;;  %v1190_v9 = vld [vmem:[%s1726_s1 + $0x58] sm:$0xff]  ;;  %v1181_v10 = vld [vmem:[%s1726_s1 + $0x10] sm:$0xff] }
   0xa   :  { %207 = vmatpush.bf16.msra.mxu0 %v1184_v4  ;;  %1229 = vmatpush.bf16.msra.mxu2 %v1184_v4  ;;  %v1189_v11 = vld [vmem:[%s1726_s1 + $0x50] sm:$0xff]  ;;  %v1180_v12 = vld [vmem:[%s1726_s1 + $0x8] sm:$0xff]  ;;  %v1179_v14 = vld [vmem:[%s1726_s1] sm:$0xff] }
   0xb   :  { %250 = vmatpush.bf16.msra.mxu1 %v1192_v5  ;;  %1237 = vmatpush.bf16.msra.mxu3 %v1192_v5  ;;  %v1188_v13 = vld [vmem:[%s1726_s1 + $0x48] sm:$0xff]  ;;  %v1187_v15 = vld [vmem:[%s1726_s1 + $0x40] sm:$0xff]  ;;  %v35_v17 = vld [vmem:[%s1725_s0 + $0x10] sm:$0xff]  ;;  %s1328_s1 = smov 256  }
   0xc   :  { %v33_v16 = vld [vmem:[%s1725_s0] sm:$0xff]  ;;  %v34_v18 = vld [vmem:[%s1725_s0 + $0x8] sm:$0xff]  ;;  %v36_v19 = vld [vmem:[%s1725_s0 + $0x18] sm:$0xff] }
   0xd   :  { %v59_v20 = vpack.c.bf16 %v35_v17, %v33_v16  ;;  %v60_v21 = vpack.c.bf16 %v36_v19, %v34_v18  ;;  %v37_v22 = vld [vmem:[%s1725_s0 + $0x20] sm:$0xff]  ;;  %v39_v23 = vld [vmem:[%s1725_s0 + $0x30] sm:$0xff]  ;;  %v38_v24 = vld [vmem:[%s1725_s0 + $0x28] sm:$0xff] }
   0xe   :  { %208 = vmatpush.bf16.msra.mxu0 %v1183_v6  ;;  %1230 = vmatpush.bf16.msra.mxu2 %v1183_v6  ;;  %v40_v25 = vld [vmem:[%s1725_s0 + $0x38] sm:$0xff]  ;;  %v61_v26 = vpack.c.bf16 %v39_v23, %v37_v22  ;;  %v49_v28 = vld [vmem:[%s1725_s0 + $0x80] sm:$0xff]  ;;  %v51_v29 = vld [vmem:[%s1725_s0 + $0x90] sm:$0xff] }
   0xf   :  { %251 = vmatpush.bf16.msra.mxu1 %v1191_v7  ;;  %1238 = vmatpush.bf16.msra.mxu3 %v1191_v7  ;;  %v62_v27 = vpack.c.bf16 %v40_v25, %v38_v24  ;;  %v67_v30 = vpack.c.bf16 %v51_v29, %v49_v28  ;;  %v50_v31 = vld [vmem:[%s1725_s0 + $0x88] sm:$0xff]  ;;  %v52_v32 = vld [vmem:[%s1725_s0 + $0x98] sm:$0xff]  ;;  %v1201_v35 = vld [vmem:[%s1728_s3 + $0x30] sm:$0xff] }
  0x10   :  { %v68_v33 = vpack.c.bf16 %v52_v32, %v50_v31  ;;  %v1202_v34 = vld [vmem:[%s1728_s3 + $0x38] sm:$0xff]  ;;  %v41_v36 = vld [vmem:[%s1725_s0 + $0x40] sm:$0xff]  ;;  %v1200_v37 = vld [vmem:[%s1728_s3 + $0x28] sm:$0xff] }
  0x11   :  { %v43_v38 = vld [vmem:[%s1725_s0 + $0x50] sm:$0xff]  ;;  %v42_v39 = vld [vmem:[%s1725_s0 + $0x48] sm:$0xff]  ;;  %v44_v40 = vld [vmem:[%s1725_s0 + $0x58] sm:$0xff] }
  0x12   :  { %209 = vmatpush.bf16.msra.mxu0 %v1182_v8  ;;  %1231 = vmatpush.bf16.msra.mxu2 %v1182_v8  ;;  %v53_v41 = vld [vmem:[%s1725_s0 + $0xa0] sm:$0xff]  ;;  %v55_v42 = vld [vmem:[%s1725_s0 + $0xb0] sm:$0xff]  ;;  %v63_v43 = vpack.c.bf16 %v43_v38, %v41_v36  ;;  %v64_v44 = vpack.c.bf16 %v44_v40, %v42_v39  ;;  %v54_v45 = vld [vmem:[%s1725_s0 + $0xa8] sm:$0xff] }
  0x13   :  { %252 = vmatpush.bf16.msra.mxu1 %v1190_v9  ;;  %1239 = vmatpush.bf16.msra.mxu3 %v1190_v9  ;;  %v56_v46 = vld [vmem:[%s1725_s0 + $0xb8] sm:$0xff]  ;;  %v1199_v47 = vld [vmem:[%s1728_s3 + $0x20] sm:$0xff]  ;;  %v69_v48 = vpack.c.bf16 %v55_v42, %v53_v41  ;;  %v1197_v51 = vld [vmem:[%s1728_s3 + $0x10] sm:$0xff] }
  0x14   :  { %v70_v49 = vpack.c.bf16 %v56_v46, %v54_v45  ;;  %v1198_v50 = vld [vmem:[%s1728_s3 + $0x18] sm:$0xff]  ;;  %v45_v52 = vld [vmem:[%s1725_s0 + $0x60] sm:$0xff]  ;;  %v47_v53 = vld [vmem:[%s1725_s0 + $0x70] sm:$0xff] }
  0x15   :  { %v46_v54 = vld [vmem:[%s1725_s0 + $0x68] sm:$0xff]  ;;  %v48_v55 = vld [vmem:[%s1725_s0 + $0x78] sm:$0xff]  ;;  %v57_v56 = vld [vmem:[%s1725_s0 + $0xc0] sm:$0xff]  ;;  %v65_v57 = vpack.c.bf16 %v47_v53, %v45_v52 }
  0x16   :  { %210 = vmatpush.bf16.msra.mxu0 %v1181_v10  ;;  %1232 = vmatpush.bf16.msra.mxu2 %v1181_v10  ;;  %v66_v58 = vpack.c.bf16 %v48_v55, %v46_v54  ;;  %v58_v59 = vld [vmem:[%s1725_s0 + $0xc8] sm:$0xff]  ;;  %v71_v60 = vpack.c.bf16 %v57_v56, %v57_v56  ;;  %v1195_v63 = vld [vmem:[%s1728_s3] sm:$0xff]  ;;  %v1210_v55 = vld [vmem:[%s1730_s5 + $0x38] sm:$0xff] }
  0x17   :  { %253 = vmatpush.bf16.msra.mxu1 %v1189_v11  ;;  %1240 = vmatpush.bf16.msra.mxu3 %v1189_v11  ;;  %v72_v61 = vpack.c.bf16 %v58_v59, %v58_v59  ;;  %v1196_v62 = vld [vmem:[%s1728_s3 + $0x8] sm:$0xff]  ;;  %v1533_v2 = vld [vmem:[%s1727_s2] ss:$0 sm:$0xff] }
  0x1a   :  { %211 = vmatpush.bf16.msra.mxu0 %v1180_v12  ;;  %1233 = vmatpush.bf16.msra.mxu2 %v1180_v12 }
  0x1b   :  { %254 = vmatpush.bf16.msra.mxu1 %v1188_v13  ;;  %1241 = vmatpush.bf16.msra.mxu3 %v1188_v13 }
  0x1e   :  { %212 = vmatpush.bf16.msra.mxu0 %v1179_v14  ;;  %1234 = vmatpush.bf16.msra.mxu2 %v1179_v14 }
  0x1f   :  { %255 = vmatpush.bf16.msra.mxu1 %v1187_v15  ;;  %1242 = vmatpush.bf16.msra.mxu3 %v1187_v15 }
  0x21   :  { %213 = vmatmul.bf16.vlgmr.msra.gmra.mxu0 %v59_v20  ;;  %233 = vmatmul.bf16.vlgmr.msra.gmra.mxu2 %v67_v30 }
  0x22   :  { %256 = vmatmul.bf16.vlgmr.msra.gmra.mxu1 %v60_v21  ;;  %276 = vmatmul.bf16.vlgmr.msra.gmra.mxu3 %v68_v33 }
  0x23   :  { %405 = vmatpush.bf16.msrb.mxu2 %v1202_v34  ;;  %562 = vmatpush.bf16.msrb.mxu3 %v1210_v55  ;;  %v1165_v55 = vld [vmem:[%s1732_s7 + $0x60] sm:$0xf] }
  0x27   :  { %406 = vmatpush.bf16.msrb.mxu2 %v1201_v35 }
  0x2b   :  { %407 = vmatpush.bf16.msrb.mxu2 %v1200_v37 }
  0x2f   :  { %408 = vmatpush.bf16.msrb.mxu2 %v1199_v47 }
  0x31   :  { %218 = vmatmul.bf16.gmra.mxu0 %v61_v26  ;;  %238 = vmatmul.bf16.gmra.mxu2 %v69_v48 }
  0x32   :  { %261 = vmatmul.bf16.gmra.mxu1 %v62_v27  ;;  %281 = vmatmul.bf16.gmra.mxu3 %v70_v49 }
  0x33   :  { %409 = vmatpush.bf16.msrb.mxu2 %v1198_v50 }
  0x37   :  { %410 = vmatpush.bf16.msrb.mxu2 %v1197_v51 }
  0x3b   :  { %411 = vmatpush.bf16.msrb.mxu2 %v1196_v62 }
  0x3f   :  { %412 = vmatpush.bf16.msrb.mxu2 %v1195_v63 }
  0x41   :  { %223 = vmatmul.bf16.gmra.mxu0 %v63_v43  ;;  %243 = vmatmul.bf16.gmra.mxu2 %v71_v60 }
  0x42   :  { %266 = vmatmul.bf16.gmra.mxu1 %v64_v44  ;;  %286 = vmatmul.bf16.gmra.mxu3 %v72_v61 }
  0x51   :  { %228 = vmatmul.bf16.gmra.mxu0 %v65_v57 }
  0x52   :  { %271 = vmatmul.bf16.gmra.mxu1 %v66_v58 }
  0x9e   :  { %v214_v0 = vpop.f32.mrf.mxu0 }
  0x9f   :  { %v257_v1 = vpop.f32.mrf.mxu1  ;;  %v215_v3 = vadd.f32 %v1533_v2, %v214_v0 }
  0xa1   :  { %v258_v6 = vadd.f32 %v257_v1, %v215_v3  ;;  %v1209_v1 = vld [vmem:[%s1730_s5 + $0x30] sm:$0xff] }
  0xa2   :  { %563 = vmatpush.bf16.msrb.mxu3 %v1209_v1 }
  0xa3   :  { %v317_v9 = vmax.f32 %v258_v6, 0.0 }
  0xa4   :  { %v234_v20 = vpop.f32.mrf.mxu2 }
  0xa5   :  { %v277_v21 = vpop.f32.mrf.mxu3  ;;  %v235_v56 = vadd.f32 %v1533_v2, %v234_v20 }
  0xa6   :  { %v216_v4 = vpop.f32.mrf.mxu0 }
  0xa7   :  { %v259_v5 = vpop.f32.mrf.mxu1  ;;  %v217_v7 = vadd.f32 %v1533_v2, %v216_v4  ;;  %v278_v58 = vadd.f32 %v277_v21, %v235_v56  ;;  %v1224_v56 = vld [vmem:[%s1732_s7 + $0x64] sm:$0xf0] }
  0xa9   :  { %v260_v8 = vadd.f32 %v259_v5, %v217_v7  ;;  %v325_v62 = vmax.f32 %v278_v58, 0.0  ;;  %v1208_v5 = vld [vmem:[%s1730_s5 + $0x28] sm:$0xff]  ;;  %v1223_v58 = vld [vmem:[%s1732_s7 + $0x64] sm:$0xf] }
  0xaa   :  { %564 = vmatpush.bf16.msrb.mxu3 %v1208_v5  ;;  %v1222_v5 = vld [vmem:[%s1732_s7 + $0x54] sm:$0xf0] }
  0xab   :  { %v318_v10 = vmax.f32 %v260_v8, 0.0  ;;  %v1207_v8 = vld [vmem:[%s1730_s5 + $0x20] sm:$0xff] }
  0xac   :  { %v236_v28 = vpop.f32.mrf.mxu2 }
  0xad   :  { %v330_v11 = vpack.c.bf16 %v318_v10, %v317_v9  ;;  %v279_v29 = vpop.f32.mrf.mxu3  ;;  %v237_v57 = vadd.f32 %v1533_v2, %v236_v28 }
  0xae   :  { %v219_v12 = vpop.f32.mrf.mxu0  ;;  %565 = vmatpush.bf16.msrb.mxu3 %v1207_v8 }
  0xaf   :  { %v262_v13 = vpop.f32.mrf.mxu1  ;;  %413 = vmatmul.bf16.vlgmr.msrb.gmra.mxu2 %v330_v11  ;;  %v220_v14 = vadd.f32 %v1533_v2, %v219_v12  ;;  %v280_v59 = vadd.f32 %v279_v29, %v237_v57  ;;  %v1206_v11 = vld [vmem:[%s1730_s5 + $0x18] sm:$0xff]  ;;  %v1166_v57 = vor.u32 %v1224_v56, %v1165_v55 }
  0xb1   :  { %v263_v17 = vadd.f32 %v262_v13, %v220_v14  ;;  %v326_v63 = vmax.f32 %v280_v59, 0.0  ;;  %v1205_v13 = vld [vmem:[%s1730_s5 + $0x10] sm:$0xff]  ;;  %v1167_v59 = vld [vmem:[%s1732_s7 + $0x68] sm:$0xf0] }
  0xb2   :  { %566 = vmatpush.bf16.msrb.mxu3 %v1206_v11  ;;  %v1220_v11 = vld [vmem:[%s1732_s7 + $0x44] sm:$0xf0] }
  0xb3   :  { %v319_v22 = vmax.f32 %v263_v17, 0.0  ;;  %v334_v0 = vpack.c.bf16 %v326_v63, %v325_v62 }
  0xb4   :  { %v239_v38 = vpop.f32.mrf.mxu2 }
  0xb5   :  { %v282_v39 = vpop.f32.mrf.mxu3  ;;  %v240_v3 = vadd.f32 %v1533_v2, %v239_v38 }
  0xb6   :  { %v221_v15 = vpop.f32.mrf.mxu0  ;;  %567 = vmatpush.bf16.msrb.mxu3 %v1205_v13  ;;  %v1219_v13 = vld [vmem:[%s1732_s7 + $0x44] sm:$0xf] }
  0xb7   :  { %v264_v16 = vpop.f32.mrf.mxu1  ;;  %v222_v18 = vadd.f32 %v1533_v2, %v221_v15  ;;  %v283_v6 = vadd.f32 %v282_v39, %v240_v3 }
  0xb9   :  { %v265_v19 = vadd.f32 %v264_v16, %v222_v18  ;;  %v327_v9 = vmax.f32 %v283_v6, 0.0  ;;  %v1204_v18 = vld [vmem:[%s1730_s5 + $0x8] sm:$0xff]  ;;  %v1221_v6 = vld [vmem:[%s1732_s7 + $0x54] sm:$0xf] }
  0xba   :  { %568 = vmatpush.bf16.msrb.mxu3 %v1204_v18  ;;  %v1218_v18 = vld [vmem:[%s1732_s7 + $0x34] sm:$0xf0] }
  0xbb   :  { %v320_v23 = vmax.f32 %v265_v19, 0.0  ;;  %v1203_v19 = vld [vmem:[%s1730_s5] sm:$0xff] }
  0xbc   :  { %v241_v46 = vpop.f32.mrf.mxu2 }
  0xbd   :  { %v331_v24 = vpack.c.bf16 %v320_v23, %v319_v22  ;;  %v284_v47 = vpop.f32.mrf.mxu3  ;;  %v242_v4 = vadd.f32 %v1533_v2, %v241_v46 }
  0xbe   :  { %v224_v25 = vpop.f32.mrf.mxu0  ;;  %569 = vmatpush.bf16.msrb.mxu3 %v1203_v19  ;;  %v1217_v19 = vld [vmem:[%s1732_s7 + $0x34] sm:$0xf] }
  0xbf   :  { %v267_v26 = vpop.f32.mrf.mxu1  ;;  %418 = vmatmul.bf16.gmra.mxu2 %v331_v24  ;;  %v225_v27 = vadd.f32 %v1533_v2, %v224_v25  ;;  %v285_v7 = vadd.f32 %v284_v47, %v242_v4  ;;  %v1157_v4 = vld [vmem:[%s1732_s7 + $0x50] sm:$0xf] }
  0xc0   :  { %v1158_v8 = vor.u32 %v1222_v5, %v1157_v4 }
  0xc1   :  { %v268_v32 = vadd.f32 %v267_v26, %v225_v27  ;;  %v328_v10 = vmax.f32 %v285_v7, 0.0 }
  0xc3   :  { %v321_v35 = vmax.f32 %v268_v32, 0.0  ;;  %v335_v12 = vpack.c.bf16 %v328_v10, %v327_v9  ;;  %v1159_v9 = vld [vmem:[%s1732_s7 + $0x58] sm:$0xf0]  ;;  %v1149_v10 = vld [vmem:[%s1732_s7 + $0x40] sm:$0xf] }
  0xc4   :  { %v244_v53 = vpop.f32.mrf.mxu2 }
  0xc5   :  { %v287_v54 = vpop.f32.mrf.mxu3  ;;  %v245_v14 = vadd.f32 %v1533_v2, %v244_v53  ;;  %v1175_v53 = vld [vmem:[%s1732_s7 + $0x78] sm:$0xf0] }
  0xc6   :  { %v226_v30 = vpop.f32.mrf.mxu0 }
  0xc7   :  { %v269_v31 = vpop.f32.mrf.mxu1  ;;  %v227_v33 = vadd.f32 %v1533_v2, %v226_v30  ;;  %v288_v15 = vadd.f32 %v287_v54, %v245_v14  ;;  %v1151_v14 = vld [vmem:[%s1732_s7 + $0x48] sm:$0xf0] }
  0xc9   :  { %v270_v34 = vadd.f32 %v269_v31, %v227_v33  ;;  %v329_v16 = vmax.f32 %v288_v15, 0.0  ;;  %v1150_v15 = vor.u32 %v1220_v11, %v1149_v10 }
  0xcb   :  { %v322_v36 = vmax.f32 %v270_v34, 0.0  ;;  %v336_v17 = vpack.c.bf16 %v329_v16, %v329_v16  ;;  %v1154_v16 = vor.u32 %v1219_v13, %v1151_v14 }
  0xcc   :  { %v246_v60 = vpop.f32.mrf.mxu2 }
  0xcd   :  { %v332_v37 = vpack.c.bf16 %v322_v36, %v321_v35  ;;  %v289_v61 = vpop.f32.mrf.mxu3  ;;  %v1170_v60 = vor.u32 %v1223_v58, %v1167_v59 }
  0xce   :  { %v229_v40 = vpop.f32.mrf.mxu0 }
  0xcf   :  { %v272_v41 = vpop.f32.mrf.mxu1  ;;  %423 = vmatmul.bf16.gmra.mxu2 %v332_v37  ;;  %v230_v42 = vadd.f32 %v1533_v2, %v229_v40 }
  0xd1   :  { %v273_v44 = vadd.f32 %v272_v41, %v230_v42 }
  0xd3   :  { %v323_v50 = vmax.f32 %v273_v44, 0.0 }
  0xd6   :  { %v231_v43 = vpop.f32.mrf.mxu0 }
  0xd7   :  { %v232_v45 = vadd.f32 %v1533_v2, %v231_v43  ;;  %v274_v48 = vpop.f32.mrf.mxu1  ;;  %v1575_v2 = vld [vmem:[%s1729_s4] ss:$0 sm:$0xff] }
  0xd9   :  { %v275_v49 = vadd.f32 %v274_v48, %v232_v45  ;;  %v1173_v48 = vld [vmem:[%s1732_s7 + $0x70] sm:$0xf] }
  0xdb   :  { %v324_v51 = vmax.f32 %v275_v49, 0.0  ;;  %v1226_v49 = vld [vmem:[%s1732_s7 + $0x74] sm:$0xf0] }
  0xdd   :  { %v333_v52 = vpack.c.bf16 %v324_v51, %v323_v50  ;;  %v1225_v50 = vld [vmem:[%s1732_s7 + $0x74] sm:$0xf] }
  0xde   :  { %v1178_v54 = vor.u32 %v1225_v50, %v1175_v53 }
  0xdf   :  { %428 = vmatmul.bf16.gmra.mxu2 %v333_v52  ;;  %v1174_v52 = vor.u32 %v1226_v49, %v1173_v48  ;;  %v1211_v48 = vld [vmem:[%s1732_s7 + $0x4] sm:$0xf] }
  0xe0   :  { %796 = vmatpush.bf16.msrb.mxu1 %v1178_v54 }
  0xe1   :  { %753 = vmatpush.bf16.msrb.mxu0 %v1174_v52  ;;  %v1248_v52 = vld [vmem:[%s1731_s6] ss:$0 sm:$0xff] }
  0xe4   :  { %797 = vmatpush.bf16.msrb.mxu1 %v1170_v60 }
  0xe5   :  { %754 = vmatpush.bf16.msrb.mxu0 %v1166_v57 }
  0xe9   :  { %755 = vmatpush.bf16.msrb.mxu0 %v1158_v8 }
  0xed   :  { %756 = vmatpush.bf16.msrb.mxu0 %v1150_v15 }
  0xef   :  { %433 = vmatmul.bf16.gmra.mxu2 %v334_v0 }
  0xff   :  { %438 = vmatmul.bf16.gmra.mxu2 %v335_v12  ;;  %v1162_v12 = vor.u32 %v1221_v6, %v1159_v9 }
 0x101   :  { %798 = vmatpush.bf16.msrb.mxu1 %v1162_v12 }
 0x105   :  { %799 = vmatpush.bf16.msrb.mxu1 %v1154_v16 }
 0x10f   :  { %443 = vmatmul.bf16.gmra.mxu2 %v336_v17  ;;  %v1141_v17 = vld [vmem:[%s1732_s7 + $0x30] sm:$0xf] }
 0x132   :  { %v414_v20 = vpop.f32.mrf.mxu2 }
 0x133   :  { %v415_v21 = vadd.f32 %v1575_v2, %v414_v20  ;;  %v1143_v20 = vld [vmem:[%s1732_s7 + $0x38] sm:$0xf0] }
 0x135   :  { %v474_v24 = vmax.f32 %v415_v21, 0.0  ;;  %v1142_v21 = vor.u32 %v1218_v18, %v1141_v17 }
 0x137   :  { %757 = vmatpush.bf16.msrb.mxu0 %v1142_v21 }
 0x13a   :  { %v416_v22 = vpop.f32.mrf.mxu2 }
 0x13b   :  { %v417_v23 = vadd.f32 %v1575_v2, %v416_v22 }
 0x13d   :  { %v475_v25 = vmax.f32 %v417_v23, 0.0  ;;  %v1146_v23 = vor.u32 %v1217_v19, %v1143_v20 }
 0x13f   :  { %v487_v26 = vpack.c.bf16 %v475_v25, %v474_v24  ;;  %v1133_v24 = vld [vmem:[%s1732_s7 + $0x20] sm:$0xf]  ;;  %v1216_v25 = vld [vmem:[%s1732_s7 + $0x24] sm:$0xf0]  ;;  %800 = vmatpush.bf16.msrb.mxu1 %v1146_v23 }
 0x141   :  { %570 = vmatmul.bf16.vlgmr.msrb.gmra.mxu3 %v487_v26 }
 0x142   :  { %v419_v27 = vpop.f32.mrf.mxu2 }
 0x143   :  { %v420_v28 = vadd.f32 %v1575_v2, %v419_v27  ;;  %v1215_v27 = vld [vmem:[%s1732_s7 + $0x24] sm:$0xf] }
 0x145   :  { %v476_v31 = vmax.f32 %v420_v28, 0.0  ;;  %v1135_v28 = vld [vmem:[%s1732_s7 + $0x28] sm:$0xf0] }
 0x14a   :  { %v421_v29 = vpop.f32.mrf.mxu2 }
 0x14b   :  { %v422_v30 = vadd.f32 %v1575_v2, %v421_v29 }
 0x14d   :  { %v477_v32 = vmax.f32 %v422_v30, 0.0  ;;  %v1134_v30 = vor.u32 %v1216_v25, %v1133_v24 }
 0x14f   :  { %v488_v33 = vpack.c.bf16 %v477_v32, %v476_v31  ;;  %758 = vmatpush.bf16.msrb.mxu0 %v1134_v30 }
 0x151   :  { %575 = vmatmul.bf16.gmra.mxu3 %v488_v33  ;;  %v1138_v33 = vor.u32 %v1215_v27, %v1135_v28 }
 0x152   :  { %v424_v34 = vpop.f32.mrf.mxu2 }
 0x153   :  { %v425_v35 = vadd.f32 %v1575_v2, %v424_v34  ;;  %v1125_v34 = vld [vmem:[%s1732_s7 + $0x10] sm:$0xf]  ;;  %801 = vmatpush.bf16.msrb.mxu1 %v1138_v33 }
 0x155   :  { %v478_v38 = vmax.f32 %v425_v35, 0.0  ;;  %v1214_v35 = vld [vmem:[%s1732_s7 + $0x14] sm:$0xf0] }
 0x15a   :  { %v426_v36 = vpop.f32.mrf.mxu2 }
 0x15b   :  { %v427_v37 = vadd.f32 %v1575_v2, %v426_v36  ;;  %v1213_v36 = vld [vmem:[%s1732_s7 + $0x14] sm:$0xf] }
 0x15d   :  { %v479_v39 = vmax.f32 %v427_v37, 0.0  ;;  %v1127_v37 = vld [vmem:[%s1732_s7 + $0x18] sm:$0xf0] }
 0x15f   :  { %v489_v40 = vpack.c.bf16 %v479_v39, %v478_v38  ;;  %v1126_v39 = vor.u32 %v1214_v35, %v1125_v34 }
 0x161   :  { %580 = vmatmul.bf16.gmra.mxu3 %v489_v40  ;;  %v1130_v40 = vor.u32 %v1213_v36, %v1127_v37  ;;  %759 = vmatpush.bf16.msrb.mxu0 %v1126_v39  ;;  %v667_v36 = vld [vmem:[%s1733_s8] sm:$0x3]  ;;  %s1327_s8 = smov [#allocation2]  }
 0x162   :  { %v429_v41 = vpop.f32.mrf.mxu2  ;;  %v1692_v37 = vperm.slane %v667_v36, 0  ;;  %s973_s24 = sshll.u32 %s1327_s8, 4  ;;  %s974_s24 = int_to_ptr.vmem [resolvable:$true] %s973_s24 }
 0x163   :  { %v430_v42 = vadd.f32 %v1575_v2, %v429_v41  ;;  %802 = vmatpush.bf16.msrb.mxu1 %v1130_v40 }
 0x165   :  { %v480_v45 = vmax.f32 %v430_v42, 0.0 }
 0x16a   :  { %v431_v43 = vpop.f32.mrf.mxu2 }
 0x16b   :  { %v432_v44 = vadd.f32 %v1575_v2, %v431_v43 }
 0x16d   :  { %v481_v46 = vmax.f32 %v432_v44, 0.0 }
 0x16f   :  { %v490_v47 = vpack.c.bf16 %v481_v46, %v480_v45  ;;  %v1117_v46 = vld [vmem:[%s1732_s7] sm:$0xf] }
 0x171   :  { %585 = vmatmul.bf16.gmra.mxu3 %v490_v47  ;;  %v1212_v47 = vld [vmem:[%s1732_s7 + $0x4] sm:$0xf0] }
 0x172   :  { %v434_v51 = vpop.f32.mrf.mxu2  ;;  %v1118_v49 = vor.u32 %v1212_v47, %v1117_v46 }
 0x173   :  { %v435_v61 = vadd.f32 %v1575_v2, %v434_v51 }
 0x174   :  { %760 = vmatpush.bf16.msrb.mxu0 %v1118_v49 }
 0x175   :  { %v482_v0 = vmax.f32 %v435_v61, 0.0 }
 0x17a   :  { %v436_v62 = vpop.f32.mrf.mxu2 }
 0x17b   :  { %v437_v63 = vadd.f32 %v1575_v2, %v436_v62 }
 0x17d   :  { %v483_v1 = vmax.f32 %v437_v63, 0.0 }
 0x17f   :  { %v491_v3 = vpack.c.bf16 %v483_v1, %v482_v0 }
 0x181   :  { %590 = vmatmul.bf16.gmra.mxu3 %v491_v3 }
 0x182   :  { %v439_v7 = vpop.f32.mrf.mxu2 }
 0x183   :  { %v440_v22 = vadd.f32 %v1575_v2, %v439_v7 }
 0x185   :  { %v484_v31 = vmax.f32 %v440_v22, 0.0 }
 0x18a   :  { %v441_v26 = vpop.f32.mrf.mxu2 }
 0x18b   :  { %v442_v29 = vadd.f32 %v1575_v2, %v441_v26 }
 0x18d   :  { %v485_v32 = vmax.f32 %v442_v29, 0.0 }
 0x18f   :  { %v492_v38 = vpack.c.bf16 %v485_v32, %v484_v31 }
 0x191   :  { %595 = vmatmul.bf16.gmra.mxu3 %v492_v38  ;;  %v1694_v38 = vperm.slane %v667_v36, 1 }
 0x192   :  { %v444_v41 = vpop.f32.mrf.mxu2 }
 0x193   :  { %v445_v42 = vadd.f32 %v1575_v2, %v444_v41  ;;  %v1119_v2 = vld [vmem:[%s1732_s7 + $0x8] sm:$0xf0] }
 0x194   :  { %v1122_v50 = vor.u32 %v1211_v48, %v1119_v2 }
 0x195   :  { %v486_v43 = vmax.f32 %v445_v42, 0.0 }
 0x196   :  { %803 = vmatpush.bf16.msrb.mxu1 %v1122_v50 }
 0x197   :  { %v493_v45 = vpack.c.bf16 %v486_v43, %v486_v43 }
 0x19a   :  { %v446_v44 = vpop.f32.mrf.mxu2 }
 0x1a1   :  { %600 = vmatmul.bf16.gmra.mxu3 %v493_v45 }
 0x1c4   :  { %v571_v51 = vpop.f32.mrf.mxu3 }
 0x1c5   :  { %v572_v53 = vadd.f32 %v1248_v52, %v571_v51 }
 0x1c7   :  { %v631_v56 = vmax.f32 %v572_v53, 0.0 }
 0x1cc   :  { %v573_v54 = vpop.f32.mrf.mxu3 }
 0x1cd   :  { %v574_v55 = vadd.f32 %v1248_v52, %v573_v54 }
 0x1cf   :  { %v632_v57 = vmax.f32 %v574_v55, 0.0 }
 0x1d1   :  { %v644_v58 = vpack.c.bf16 %v632_v57, %v631_v56 }
 0x1d3   :  { %761 = vmatmul.bf16.vlgmr.msrb.gmra.mxu0 %v644_v58  ;;  %804 = vmatmul.bf16.vlgmr.msrb.gmra.mxu1 %v644_v58 }
 0x1d4   :  { %v576_v59 = vpop.f32.mrf.mxu3 }
 0x1d5   :  { %v577_v60 = vadd.f32 %v1248_v52, %v576_v59 }
 0x1d7   :  { %v633_v63 = vmax.f32 %v577_v60, 0.0 }
 0x1dc   :  { %v578_v61 = vpop.f32.mrf.mxu3 }
 0x1dd   :  { %v579_v62 = vadd.f32 %v1248_v52, %v578_v61 }
 0x1df   :  { %v634_v0 = vmax.f32 %v579_v62, 0.0 }
 0x1e1   :  { %v645_v1 = vpack.c.bf16 %v634_v0, %v633_v63 }
 0x1e3   :  { %766 = vmatmul.bf16.gmra.mxu0 %v645_v1  ;;  %809 = vmatmul.bf16.gmra.mxu1 %v645_v1 }
 0x1e4   :  { %v581_v3 = vpop.f32.mrf.mxu3 }
 0x1e5   :  { %v582_v4 = vadd.f32 %v1248_v52, %v581_v3 }
 0x1e7   :  { %v635_v7 = vmax.f32 %v582_v4, 0.0 }
 0x1ec   :  { %v583_v5 = vpop.f32.mrf.mxu3 }
 0x1ed   :  { %v584_v6 = vadd.f32 %v1248_v52, %v583_v5 }
 0x1ef   :  { %v636_v8 = vmax.f32 %v584_v6, 0.0 }
 0x1f1   :  { %v646_v9 = vpack.c.bf16 %v636_v8, %v635_v7 }
 0x1f3   :  { %771 = vmatmul.bf16.gmra.mxu0 %v646_v9  ;;  %814 = vmatmul.bf16.gmra.mxu1 %v646_v9 }
 0x1f4   :  { %v586_v10 = vpop.f32.mrf.mxu3 }
 0x1f5   :  { %v587_v11 = vadd.f32 %v1248_v52, %v586_v10 }
 0x1f7   :  { %v637_v14 = vmax.f32 %v587_v11, 0.0 }
 0x1fc   :  { %v588_v12 = vpop.f32.mrf.mxu3 }
 0x1fd   :  { %v589_v13 = vadd.f32 %v1248_v52, %v588_v12 }
 0x1ff   :  { %v638_v15 = vmax.f32 %v589_v13, 0.0 }
 0x201   :  { %v647_v16 = vpack.c.bf16 %v638_v15, %v637_v14 }
 0x203   :  { %776 = vmatmul.bf16.gmra.mxu0 %v647_v16  ;;  %819 = vmatmul.bf16.gmra.mxu1 %v647_v16 }
 0x204   :  { %v591_v17 = vpop.f32.mrf.mxu3 }
 0x205   :  { %v592_v18 = vadd.f32 %v1248_v52, %v591_v17 }
 0x207   :  { %v639_v21 = vmax.f32 %v592_v18, 0.0 }
 0x20c   :  { %v593_v19 = vpop.f32.mrf.mxu3 }
 0x20d   :  { %v594_v20 = vadd.f32 %v1248_v52, %v593_v19 }
 0x20f   :  { %v640_v22 = vmax.f32 %v594_v20, 0.0 }
 0x211   :  { %v648_v23 = vpack.c.bf16 %v640_v22, %v639_v21 }
 0x213   :  { %781 = vmatmul.bf16.gmra.mxu0 %v648_v23  ;;  %824 = vmatmul.bf16.gmra.mxu1 %v648_v23 }
 0x214   :  { %v596_v24 = vpop.f32.mrf.mxu3 }
 0x215   :  { %v597_v25 = vadd.f32 %v1248_v52, %v596_v24 }
 0x217   :  { %v641_v28 = vmax.f32 %v597_v25, 0.0 }
 0x21c   :  { %v598_v26 = vpop.f32.mrf.mxu3 }
 0x21d   :  { %v599_v27 = vadd.f32 %v1248_v52, %v598_v26 }
 0x21f   :  { %v642_v29 = vmax.f32 %v599_v27, 0.0 }
 0x221   :  { %v649_v30 = vpack.c.bf16 %v642_v29, %v641_v28 }
 0x223   :  { %786 = vmatmul.bf16.gmra.mxu0 %v649_v30  ;;  %829 = vmatmul.bf16.gmra.mxu1 %v649_v30 }
 0x224   :  { %v601_v31 = vpop.f32.mrf.mxu3 }
 0x225   :  { %v602_v32 = vadd.f32 %v1248_v52, %v601_v31 }
 0x227   :  { %v643_v33 = vmax.f32 %v602_v32, 0.0 }
 0x229   :  { %v650_v35 = vpack.c.bf16 %v643_v33, %v643_v33 }
 0x22c   :  { %v603_v34 = vpop.f32.mrf.mxu3 }
 0x233   :  { %791 = vmatmul.bf16.gmra.mxu0 %v650_v35  ;;  %834 = vmatmul.bf16.gmra.mxu1 %v650_v35 }
 0x250   :  { %v762_v39 = vpop.f32.mrf.mxu0  ;;  %v805_v40 = vpop.f32.mrf.mxu1 }
 0x251   :  { %v763_v41 = vadd.f32 %v762_v39, %v1692_v37  ;;  %v806_v42 = vadd.f32 %v805_v40, %v1694_v38 }
 0x253   :  { %v839_v43 = vmul.f32 0.5, %v763_v41  ;;  %v840_v44 = vmul.f32 0.5, %v806_v42 }
 0x255   :  { %1249 = vtanh.f32 %v839_v43 }
 0x256   :  { %1251 = vtanh.f32 %v840_v44 }
 0x258   :  { %v764_v45 = vpop.f32.mrf.mxu0  ;;  %v807_v46 = vpop.f32.mrf.mxu1 }
 0x259   :  { %v765_v47 = vadd.f32 %v764_v45, %v1692_v37  ;;  %v808_v48 = vadd.f32 %v807_v46, %v1694_v38 }
 0x25b   :  { %v1250_v49 = vpop.eup %1249  ;;  %v841_v2 = vmul.f32 0.5, %v765_v47  ;;  %v842_v50 = vmul.f32 0.5, %v808_v48 }
 0x25c   :  { %v1252_v51 = vpop.eup %1251  ;;  %v891_v52 = vmul.f32 0.5, %v1250_v49 }
 0x25d   :  { %v892_v53 = vmul.f32 0.5, %v1252_v51  ;;  %1253 = vtanh.f32 %v841_v2 }
 0x25e   :  { %v917_v54 = vadd.f32 0.5, %v891_v52  ;;  %1255 = vtanh.f32 %v842_v50 }
 0x25f   :  { %v918_v55 = vadd.f32 0.5, %v892_v53 }
 0x260   :  { %943 = vst [vmem:[#allocation2] sm:$0xff] %v917_v54  ;;  %v767_v56 = vpop.f32.mrf.mxu0  ;;  %v810_v57 = vpop.f32.mrf.mxu1 }
 0x261   :  { %944 = vst [vmem:[#allocation2 + $0x8] sm:$0xff] %v918_v55  ;;  %v768_v58 = vadd.f32 %v767_v56, %v1692_v37  ;;  %v811_v59 = vadd.f32 %v810_v57, %v1694_v38 }
 0x263   :  { %v1254_v60 = vpop.eup %1253  ;;  %v843_v61 = vmul.f32 0.5, %v768_v58  ;;  %v844_v62 = vmul.f32 0.5, %v811_v59 }
 0x264   :  { %v1256_v63 = vpop.eup %1255  ;;  %v893_v0 = vmul.f32 0.5, %v1254_v60 }
 0x265   :  { %v894_v1 = vmul.f32 0.5, %v1256_v63  ;;  %1257 = vtanh.f32 %v843_v61 }
 0x266   :  { %v919_v3 = vadd.f32 0.5, %v893_v0  ;;  %1259 = vtanh.f32 %v844_v62 }
 0x267   :  { %v920_v4 = vadd.f32 0.5, %v894_v1 }
 0x268   :  { %945 = vst [vmem:[#allocation2 + $0x10] sm:$0xff] %v919_v3  ;;  %v769_v5 = vpop.f32.mrf.mxu0  ;;  %v812_v6 = vpop.f32.mrf.mxu1 }
 0x269   :  { %946 = vst [vmem:[#allocation2 + $0x18] sm:$0xff] %v920_v4  ;;  %v770_v7 = vadd.f32 %v769_v5, %v1692_v37  ;;  %v813_v8 = vadd.f32 %v812_v6, %v1694_v38 }
 0x26b   :  { %v1258_v9 = vpop.eup %1257  ;;  %v845_v10 = vmul.f32 0.5, %v770_v7  ;;  %v846_v11 = vmul.f32 0.5, %v813_v8 }
 0x26c   :  { %v1260_v12 = vpop.eup %1259  ;;  %v895_v13 = vmul.f32 0.5, %v1258_v9 }
 0x26d   :  { %v896_v14 = vmul.f32 0.5, %v1260_v12  ;;  %1261 = vtanh.f32 %v845_v10 }
 0x26e   :  { %v921_v15 = vadd.f32 0.5, %v895_v13  ;;  %1263 = vtanh.f32 %v846_v11 }
 0x26f   :  { %v922_v16 = vadd.f32 0.5, %v896_v14 }
 0x270   :  { %947 = vst [vmem:[#allocation2 + $0x20] sm:$0xff] %v921_v15  ;;  %v772_v17 = vpop.f32.mrf.mxu0  ;;  %v815_v18 = vpop.f32.mrf.mxu1 }
 0x271   :  { %948 = vst [vmem:[#allocation2 + $0x28] sm:$0xff] %v922_v16  ;;  %v773_v19 = vadd.f32 %v772_v17, %v1692_v37  ;;  %v816_v20 = vadd.f32 %v815_v18, %v1694_v38 }
 0x273   :  { %v1262_v21 = vpop.eup %1261  ;;  %v847_v22 = vmul.f32 0.5, %v773_v19  ;;  %v848_v23 = vmul.f32 0.5, %v816_v20 }
 0x274   :  { %v1264_v24 = vpop.eup %1263  ;;  %v897_v25 = vmul.f32 0.5, %v1262_v21 }
 0x275   :  { %v898_v26 = vmul.f32 0.5, %v1264_v24  ;;  %1265 = vtanh.f32 %v847_v22 }
 0x276   :  { %v923_v27 = vadd.f32 0.5, %v897_v25  ;;  %1267 = vtanh.f32 %v848_v23 }
 0x277   :  { %v924_v28 = vadd.f32 0.5, %v898_v26 }
 0x278   :  { %949 = vst [vmem:[#allocation2 + $0x30] sm:$0xff] %v923_v27  ;;  %v774_v29 = vpop.f32.mrf.mxu0  ;;  %v817_v30 = vpop.f32.mrf.mxu1 }
 0x279   :  { %950 = vst [vmem:[#allocation2 + $0x38] sm:$0xff] %v924_v28  ;;  %v775_v31 = vadd.f32 %v774_v29, %v1692_v37  ;;  %v818_v32 = vadd.f32 %v817_v30, %v1694_v38 }
 0x27b   :  { %v1266_v33 = vpop.eup %1265  ;;  %v849_v34 = vmul.f32 0.5, %v775_v31  ;;  %v850_v35 = vmul.f32 0.5, %v818_v32 }
 0x27c   :  { %v1268_v36 = vpop.eup %1267  ;;  %v899_v39 = vmul.f32 0.5, %v1266_v33 }
 0x27d   :  { %v900_v40 = vmul.f32 0.5, %v1268_v36  ;;  %1269 = vtanh.f32 %v849_v34 }
 0x27e   :  { %v925_v41 = vadd.f32 0.5, %v899_v39  ;;  %1271 = vtanh.f32 %v850_v35 }
 0x27f   :  { %v926_v42 = vadd.f32 0.5, %v900_v40 }
 0x280   :  { %951 = vst [vmem:[#allocation2 + $0x40] sm:$0xff] %v925_v41  ;;  %v777_v43 = vpop.f32.mrf.mxu0  ;;  %v820_v44 = vpop.f32.mrf.mxu1 }
 0x281   :  { %952 = vst [vmem:[#allocation2 + $0x48] sm:$0xff] %v926_v42  ;;  %v778_v45 = vadd.f32 %v777_v43, %v1692_v37  ;;  %v821_v46 = vadd.f32 %v820_v44, %v1694_v38 }
 0x283   :  { %v1270_v47 = vpop.eup %1269  ;;  %v851_v48 = vmul.f32 0.5, %v778_v45  ;;  %v852_v49 = vmul.f32 0.5, %v821_v46 }
 0x284   :  { %v1272_v2 = vpop.eup %1271  ;;  %v901_v50 = vmul.f32 0.5, %v1270_v47 }
 0x285   :  { %v902_v51 = vmul.f32 0.5, %v1272_v2  ;;  %1273 = vtanh.f32 %v851_v48 }
 0x286   :  { %v927_v52 = vadd.f32 0.5, %v901_v50  ;;  %1275 = vtanh.f32 %v852_v49 }
 0x287   :  { %v928_v53 = vadd.f32 0.5, %v902_v51 }
 0x288   :  { %953 = vst [vmem:[#allocation2 + $0x50] sm:$0xff] %v927_v52  ;;  %v779_v54 = vpop.f32.mrf.mxu0  ;;  %v822_v55 = vpop.f32.mrf.mxu1 }
 0x289   :  { %954 = vst [vmem:[#allocation2 + $0x58] sm:$0xff] %v928_v53  ;;  %v780_v56 = vadd.f32 %v779_v54, %v1692_v37  ;;  %v823_v57 = vadd.f32 %v822_v55, %v1694_v38 }
 0x28b   :  { %v1274_v58 = vpop.eup %1273  ;;  %v853_v59 = vmul.f32 0.5, %v780_v56  ;;  %v854_v60 = vmul.f32 0.5, %v823_v57 }
 0x28c   :  { %v1276_v61 = vpop.eup %1275  ;;  %v903_v62 = vmul.f32 0.5, %v1274_v58 }
 0x28d   :  { %v904_v63 = vmul.f32 0.5, %v1276_v61  ;;  %1277 = vtanh.f32 %v853_v59 }
 0x28e   :  { %v929_v0 = vadd.f32 0.5, %v903_v62  ;;  %1279 = vtanh.f32 %v854_v60 }
 0x28f   :  { %v930_v1 = vadd.f32 0.5, %v904_v63 }
 0x290   :  { %955 = vst [vmem:[#allocation2 + $0x60] sm:$0xff] %v929_v0  ;;  %v782_v3 = vpop.f32.mrf.mxu0  ;;  %v825_v4 = vpop.f32.mrf.mxu1 }
 0x291   :  { %956 = vst [vmem:[#allocation2 + $0x68] sm:$0xff] %v930_v1  ;;  %v783_v5 = vadd.f32 %v782_v3, %v1692_v37  ;;  %v826_v6 = vadd.f32 %v825_v4, %v1694_v38 }
 0x293   :  { %v1278_v7 = vpop.eup %1277  ;;  %v855_v8 = vmul.f32 0.5, %v783_v5  ;;  %v856_v9 = vmul.f32 0.5, %v826_v6 }
 0x294   :  { %v1280_v10 = vpop.eup %1279  ;;  %v905_v11 = vmul.f32 0.5, %v1278_v7 }
 0x295   :  { %v906_v12 = vmul.f32 0.5, %v1280_v10  ;;  %1281 = vtanh.f32 %v855_v8 }
 0x296   :  { %v931_v13 = vadd.f32 0.5, %v905_v11  ;;  %1283 = vtanh.f32 %v856_v9 }
 0x297   :  { %v932_v14 = vadd.f32 0.5, %v906_v12 }
 0x298   :  { %957 = vst [vmem:[#allocation2 + $0x70] sm:$0xff] %v931_v13  ;;  %v784_v15 = vpop.f32.mrf.mxu0  ;;  %v827_v16 = vpop.f32.mrf.mxu1 }
 0x299   :  { %958 = vst [vmem:[#allocation2 + $0x78] sm:$0xff] %v932_v14  ;;  %v785_v17 = vadd.f32 %v784_v15, %v1692_v37  ;;  %v828_v18 = vadd.f32 %v827_v16, %v1694_v38 }
 0x29b   :  { %v1282_v19 = vpop.eup %1281  ;;  %v857_v20 = vmul.f32 0.5, %v785_v17  ;;  %v858_v21 = vmul.f32 0.5, %v828_v18 }
 0x29c   :  { %v1284_v22 = vpop.eup %1283  ;;  %v907_v23 = vmul.f32 0.5, %v1282_v19 }
 0x29d   :  { %v908_v24 = vmul.f32 0.5, %v1284_v22  ;;  %1285 = vtanh.f32 %v857_v20 }
 0x29e   :  { %v933_v25 = vadd.f32 0.5, %v907_v23  ;;  %1287 = vtanh.f32 %v858_v21 }
 0x29f   :  { %v934_v26 = vadd.f32 0.5, %v908_v24 }
 0x2a0   :  { %959 = vst [vmem:[#allocation2 + $0x80] sm:$0xff] %v933_v25  ;;  %v787_v27 = vpop.f32.mrf.mxu0  ;;  %v830_v28 = vpop.f32.mrf.mxu1 }
 0x2a1   :  { %960 = vst [vmem:[#allocation2 + $0x88] sm:$0xff] %v934_v26  ;;  %v788_v29 = vadd.f32 %v787_v27, %v1692_v37  ;;  %v831_v30 = vadd.f32 %v830_v28, %v1694_v38 }
 0x2a3   :  { %v1286_v31 = vpop.eup %1285  ;;  %v859_v32 = vmul.f32 0.5, %v788_v29  ;;  %v860_v33 = vmul.f32 0.5, %v831_v30 }
 0x2a4   :  { %v1288_v34 = vpop.eup %1287  ;;  %v909_v35 = vmul.f32 0.5, %v1286_v31 }
 0x2a5   :  { %v910_v36 = vmul.f32 0.5, %v1288_v34  ;;  %1289 = vtanh.f32 %v859_v32 }
 0x2a6   :  { %v935_v39 = vadd.f32 0.5, %v909_v35  ;;  %1291 = vtanh.f32 %v860_v33 }
 0x2a7   :  { %v936_v40 = vadd.f32 0.5, %v910_v36 }
 0x2a8   :  { %961 = vst [vmem:[#allocation2 + $0x90] sm:$0xff] %v935_v39  ;;  %v789_v41 = vpop.f32.mrf.mxu0  ;;  %v832_v42 = vpop.f32.mrf.mxu1 }
 0x2a9   :  { %962 = vst [vmem:[#allocation2 + $0x98] sm:$0xff] %v936_v40  ;;  %v790_v43 = vadd.f32 %v789_v41, %v1692_v37  ;;  %v833_v44 = vadd.f32 %v832_v42, %v1694_v38 }
 0x2ab   :  { %v1290_v45 = vpop.eup %1289  ;;  %v861_v46 = vmul.f32 0.5, %v790_v43  ;;  %v862_v47 = vmul.f32 0.5, %v833_v44 }
 0x2ac   :  { %v1292_v48 = vpop.eup %1291  ;;  %v911_v49 = vmul.f32 0.5, %v1290_v45 }
 0x2ad   :  { %v912_v2 = vmul.f32 0.5, %v1292_v48  ;;  %1293 = vtanh.f32 %v861_v46 }
 0x2ae   :  { %v937_v50 = vadd.f32 0.5, %v911_v49  ;;  %1295 = vtanh.f32 %v862_v47 }
 0x2af   :  { %v938_v51 = vadd.f32 0.5, %v912_v2 }
 0x2b0   :  { %963 = vst [vmem:[#allocation2 + $0xa0] sm:$0xff] %v937_v50  ;;  %v792_v52 = vpop.f32.mrf.mxu0  ;;  %v835_v53 = vpop.f32.mrf.mxu1 }
 0x2b1   :  { %964 = vst [vmem:[#allocation2 + $0xa8] sm:$0xff] %v938_v51  ;;  %v793_v54 = vadd.f32 %v792_v52, %v1692_v37  ;;  %v836_v55 = vadd.f32 %v835_v53, %v1694_v38 }
 0x2b3   :  { %v1294_v56 = vpop.eup %1293  ;;  %v863_v57 = vmul.f32 0.5, %v793_v54  ;;  %v864_v58 = vmul.f32 0.5, %v836_v55 }
 0x2b4   :  { %v1296_v59 = vpop.eup %1295  ;;  %v913_v60 = vmul.f32 0.5, %v1294_v56 }
 0x2b5   :  { %v914_v61 = vmul.f32 0.5, %v1296_v59  ;;  %1297 = vtanh.f32 %v863_v57 }
 0x2b6   :  { %v939_v62 = vadd.f32 0.5, %v913_v60  ;;  %1299 = vtanh.f32 %v864_v58 }
 0x2b7   :  { %v940_v63 = vadd.f32 0.5, %v914_v61 }
 0x2b8   :  { %965 = vst [vmem:[#allocation2 + $0xb0] sm:$0xff] %v939_v62  ;;  %v794_v0 = vpop.f32.mrf.mxu0  ;;  %v837_v1 = vpop.f32.mrf.mxu1 }
 0x2b9   :  { %966 = vst [vmem:[#allocation2 + $0xb8] sm:$0xff] %v940_v63 }
 0x2bb   :  { %v1298_v3 = vpop.eup %1297 }
 0x2bc   :  { %v1300_v37 = vpop.eup %1299  ;;  %v915_v38 = vmul.f32 0.5, %v1298_v3 }
 0x2bd   :  { %v916_v4 = vmul.f32 0.5, %v1300_v37 }
 0x2be   :  { %v941_v5 = vadd.f32 0.5, %v915_v38 }
 0x2bf   :  { %v942_v6 = vadd.f32 0.5, %v916_v4 }
 0x2c0   :  { %967 = vst [vmem:[#allocation2 + $0xc0] sm:$0xff] %v941_v5 }
 0x2c1   :  { %968 = vst [vmem:[#allocation2 + $0xc8] sm:$0xff] %v942_v6 }
 0x2c2   :  { %981 = dma.vmem_to_hbm [thread:$0]  %s974_s24, 3328, %s976_s27, [#allocation3], %s1328_s1, %s1328_s1, %s1329_s28  }
 0x2c3   :  { %1325 = dma.done.wait [#allocation3], 3328  }
 0x2c4   :  { %1326 = vsyncadd [#allocation3], 4294963968 }
 0x2c5   :  { %986 = vsyncpa [#allocation3], 1 }

</bundles_post_ra>
